<compile_context>
chip_gen: v7x
topology: tpu7x:2x2x1
jax: 0.10.0
libtpu: 0.0.40
codegen_flags: <defaults>
</compile_context>

<pallas_src>
import functools

import jax
import jax.numpy as jnp
from jax import lax
from jax.experimental import pallas as pl
from jax.experimental.pallas import tpu as pltpu


def _round_up(x, m):
    return ((x + m - 1) // m) * m


def _mlp_kernel(ids_ref, feat_ref, w_ref, b_ref, out_ref):
    # ids_ref : (tile_n, 1)     int32   VMEM -- node ids for this tile
    # feat_ref: (V_pad, D_pad)  float32 VMEM -- full padded embedding table (resident)
    # w_ref   : (D_pad, E_pad)  float32 VMEM -- Linear weight, transposed + padded
    # b_ref   : (1, E_pad)      float32 VMEM -- Linear bias (padded)
    # out_ref : (tile_n, E_pad) float32 -- output tile (lane-dense, 128-wide)
    tile_n = out_ref.shape[0]
    v_pad = feat_ref.shape[0]

    # One-hot MXU gather: ids outside [0, V) (e.g. batch padding of -1) produce
    # an all-zero one-hot row -> zero gathered row; those rows are sliced off in
    # the wrapper.  (PyTorch would raise on out-of-range ids; here they yield
    # relu(bias) rows instead -- semantic note, not a numeric bug.)
    ids = ids_ref[...]                                             # (tile_n, 1) int32
    cols = lax.broadcasted_iota(jnp.int32, (tile_n, v_pad), 1)     # (tile_n, V_pad)
    onehot = (cols == ids).astype(jnp.float32)                     # (tile_n, V_pad)
    gathered = jnp.dot(onehot, feat_ref[...],
                       preferred_element_type=jnp.float32)         # (tile_n, D_pad)

    # Linear + bias + ReLU on full 128-wide MXU tiles (f32 accumulate).
    h = jnp.dot(gathered, w_ref[...], preferred_element_type=jnp.float32)
    h = h + b_ref[...]
    out_ref[...] = jnp.maximum(h, 0.0).astype(out_ref.dtype)


def prepare_mlp_params(features, weight, bias):
    """One-time setup: pad table/weight/bias to MXU-friendly shapes.

    Hoisted out of the per-call path so the V x D table is not re-read and
    re-written through HBM on every forward call.
    weight is the nn.Linear weight with shape [E, D]; bias has shape [E].
    """
    v, d = features.shape
    e = weight.shape[0]
    v_pad = _round_up(v, 8)       # sublane alignment for the resident table
    d_pad = _round_up(d, 128)     # lane-dense contraction dim
    e_pad = _round_up(e, 128)     # lane-dense output dim (unmasked vst)

    feat_p = jnp.pad(features.astype(jnp.float32),
                     ((0, v_pad - v), (0, d_pad - d)))
    w_p = jnp.pad(weight.T.astype(jnp.float32),
                  ((0, d_pad - d), (0, e_pad - e)))
    b_p = jnp.pad(bias.astype(jnp.float32), (0, e_pad - e)).reshape(1, e_pad)
    return feat_p, w_p, b_p, (v, d, e)


def _vmem_limit_bytes(v_pad, d_pad, e_pad, tile_n):
    f32 = 4
    resident = (v_pad * d_pad + d_pad * e_pad + e_pad) * f32   # single-buffered constants
    streamed = 2 * (tile_n * 4 + tile_n * e_pad * f32)         # double-buffered ids + out
    need = resident + streamed
    # Generous headroom; floor at the 32 MiB default scope, cap at 48 MiB (v7x-safe).
    return int(min(max(2 * need, 32 << 20), 48 << 20))


@functools.partial(jax.jit, static_argnames=("e", "tile_n"))
def mlp_pallas(nodes, feat_p, w_p, b_p, e, *, tile_n=128):
    """nodes: int [N]; feat_p: [V_pad, D_pad]; w_p: [D_pad, E_pad]; b_p: [1, E_pad]."""
    n = nodes.shape[0]
    v_pad, d_pad = feat_p.shape
    e_pad = w_p.shape[1]
    n_pad = _round_up(n, tile_n)

    # Pad node ids with -1 -> all-zero one-hot rows; results sliced off below.
    ids = jnp.pad(nodes.astype(jnp.int32), (0, n_pad - n),
                  constant_values=-1).reshape(n_pad, 1)

    grid = (n_pad // tile_n,)

    out = pl.pallas_call(
        _mlp_kernel,
        out_shape=jax.ShapeDtypeStruct((n_pad, e_pad), jnp.float32),
        grid_spec=pltpu.PrefetchScalarGridSpec(
            num_scalar_prefetch=0,
            grid=grid,
            in_specs=[
                # ids: streamed per node tile.
                pl.BlockSpec((tile_n, 1), lambda i: (i, 0)),
                # Constant-index resident operands: single buffer (block never changes).
                pl.BlockSpec((v_pad, d_pad), lambda i: (0, 0),
                             pipeline_mode=pl.Buffered(1)),
                pl.BlockSpec((d_pad, e_pad), lambda i: (0, 0),
                             pipeline_mode=pl.Buffered(1)),
                pl.BlockSpec((1, e_pad), lambda i: (0, 0),
                             pipeline_mode=pl.Buffered(1)),
            ],
            out_specs=pl.BlockSpec((tile_n, e_pad), lambda i: (i, 0)),
        ),
        compiler_params=pltpu.CompilerParams(
            dimension_semantics=("parallel",),   # node tiles are independent
            vmem_limit_bytes=_vmem_limit_bytes(v_pad, d_pad, e_pad, tile_n),
        ),
    )(ids, feat_p, w_p, b_p)

    return out[:n, :e]


def mlp_reference(nodes, features, weight, bias):
    gathered = jnp.take(features, nodes, axis=0)
    return jax.nn.relu(gathered @ weight.T + bias)


if __name__ == "__main__":
    # Small synthetic sizes consistent with the module's __init__ / forward.
    num_nodes_total = 64   # rows in the `features` embedding table (V)
    feature_dim = 48       # D (padded to 128 inside prepare_mlp_params)
    embed_dim = 24         # E (padded to 128 inside prepare_mlp_params)
    batch = 200            # number of node ids (padded to 256 -> grid of 2 tiles)

    key = jax.random.PRNGKey(0)
    k_feat, k_w, k_b, k_nodes = jax.random.split(key, 4)

    features = jax.random.normal(k_feat, (num_nodes_total, feature_dim),
                                 dtype=jnp.float32)
    # nn.Linear(feature_dim, embed_dim): weight [E, D], bias [E]
    weight = jax.random.normal(k_w, (embed_dim, feature_dim),
                               dtype=jnp.float32) * (1.0 / jnp.sqrt(feature_dim))
    bias = jax.random.normal(k_b, (embed_dim,), dtype=jnp.float32) * 0.01

    nodes = jax.random.randint(k_nodes, (batch,), 0, num_nodes_total,
                               dtype=jnp.int32)

    # One-time parameter preparation (padding hoisted out of the hot path).
    feat_p, w_p, b_p, (v, d, e) = prepare_mlp_params(features, weight, bias)

    out = mlp_pallas(nodes, feat_p, w_p, b_p, e, tile_n=128)
    out = jax.block_until_ready(out)

    ref = mlp_reference(nodes, features, weight, bias)
    assert out.shape == (batch, embed_dim)
    assert jnp.allclose(out, ref, atol=1e-4, rtol=1e-4), "mismatch vs reference"

    print("KERNEL_OK")
</pallas_src>

<mosaic_0001>
module attributes {stable_mosaic.version = 11 : i64} {
  func.func @_mlp_kernel(%arg0: i32, %arg1: memref<128x1xi32, #tpu.memory_space<vmem>>, %arg2: memref<64x128xf32, #tpu.memory_space<vmem>>, %arg3: memref<128x128xf32, #tpu.memory_space<vmem>>, %arg4: memref<1x128xf32, #tpu.memory_space<vmem>>, %arg5: memref<128x128xf32, #tpu.memory_space<vmem>>) attributes {dimension_semantics = [#tpu.dimension_semantics<parallel>], iteration_bounds = array<i64: 2>, scalar_prefetch = 0 : i64, scratch_operands = 0 : i64, tpu.core_type = #tpu.core_type<tc>, window_params = [{transform_indices = @transform_0, window_bounds = array<i64: 128, 1>}, {pipeline_mode = #tpu.pipeline_mode<synchronous>, transform_indices = @transform_1, window_bounds = array<i64: 64, 128>}, {pipeline_mode = #tpu.pipeline_mode<synchronous>, transform_indices = @transform_2, window_bounds = array<i64: 128, 128>}, {pipeline_mode = #tpu.pipeline_mode<synchronous>, transform_indices = @transform_3, window_bounds = array<i64: 1, 128>}, {transform_indices = @transform_4, window_bounds = array<i64: 128, 128>}]} {
    %c0 = arith.constant 0 : index
    %c0_0 = arith.constant 0 : index
    %0 = vector.load %arg1[%c0, %c0_0] : memref<128x1xi32, #tpu.memory_space<vmem>>, vector<128x1xi32>
    %1 = tpu.iota {dimensions = array<i32: 1>} : vector<128x64xi32>
    %2 = vector.broadcast %0 : vector<128x1xi32> to vector<128x64xi32>
    %3 = arith.cmpi eq, %1, %2 : vector<128x64xi32>
    %4 = arith.extui %3 : vector<128x64xi1> to vector<128x64xi32>
    %5 = arith.sitofp %4 : vector<128x64xi32> to vector<128x64xf32>
    %c0_1 = arith.constant 0 : index
    %c0_2 = arith.constant 0 : index
    %6 = vector.load %arg2[%c0_1, %c0_2] : memref<64x128xf32, #tpu.memory_space<vmem>>, vector<64x128xf32>
    %cst = arith.constant dense<0.000000e+00> : vector<128x128xf32>
    %7 = tpu.matmul %5, %6, %cst {dimension_numbers = #tpu.dot_dimension_numbers<[1], [0], [0], [1], [0, 0, 1, 1], [], []>} : vector<128x64xf32>, vector<64x128xf32>, vector<128x128xf32> -> vector<128x128xf32>
    %c0_3 = arith.constant 0 : index
    %c0_4 = arith.constant 0 : index
    %8 = vector.load %arg3[%c0_3, %c0_4] : memref<128x128xf32, #tpu.memory_space<vmem>>, vector<128x128xf32>
    %cst_5 = arith.constant dense<0.000000e+00> : vector<128x128xf32>
    %9 = tpu.matmul %7, %8, %cst_5 {dimension_numbers = #tpu.dot_dimension_numbers<[1], [0], [0], [1], [0, 0, 1, 1], [], []>} : vector<128x128xf32>, vector<128x128xf32>, vector<128x128xf32> -> vector<128x128xf32>
    %c0_6 = arith.constant 0 : index
    %c0_7 = arith.constant 0 : index
    %10 = vector.load %arg4[%c0_6, %c0_7] : memref<1x128xf32, #tpu.memory_space<vmem>>, vector<1x128xf32>
    %11 = vector.broadcast %10 : vector<1x128xf32> to vector<128x128xf32>
    %12 = arith.addf %9, %11 : vector<128x128xf32>
    %cst_8 = arith.constant 0.000000e+00 : f32
    %13 = vector.broadcast %cst_8 : f32 to vector<128x128xf32>
    %14 = arith.maximumf %12, %13 : vector<128x128xf32>
    %c0_9 = arith.constant 0 : index
    %c0_10 = arith.constant 0 : index
    %15 = vector.load %arg5[%c0_9, %c0_10] : memref<128x128xf32, #tpu.memory_space<vmem>>, vector<128x128xf32>
    tpu.vector_store %arg5[%c0_9, %c0_10], %14 {strides = array<i32>} : memref<128x128xf32, #tpu.memory_space<vmem>>, vector<128x128xf32>,
    return
  }
  func.func @transform_0(%arg0: i32) -> (i32, i32) {
    %c0_i32 = arith.constant 0 : i32
    %c0_i32_0 = arith.constant 0 : i32
    return %arg0, %c0_i32 : i32, i32
  }
  func.func @transform_1(%arg0: i32) -> (i32, i32) {
    %c0_i32 = arith.constant 0 : i32
    %c0_i32_0 = arith.constant 0 : i32
    %c0_i32_1 = arith.constant 0 : i32
    return %c0_i32, %c0_i32_0 : i32, i32
  }
  func.func @transform_2(%arg0: i32) -> (i32, i32) {
    %c0_i32 = arith.constant 0 : i32
    %c0_i32_0 = arith.constant 0 : i32
    %c0_i32_1 = arith.constant 0 : i32
    return %c0_i32, %c0_i32_0 : i32, i32
  }
  func.func @transform_3(%arg0: i32) -> (i32, i32) {
    %c0_i32 = arith.constant 0 : i32
    %c0_i32_0 = arith.constant 0 : i32
    %c0_i32_1 = arith.constant 0 : i32
    return %c0_i32, %c0_i32_0 : i32, i32
  }
  func.func @transform_4(%arg0: i32) -> (i32, i32) {
    %c0_i32 = arith.constant 0 : i32
    %c0_i32_0 = arith.constant 0 : i32
    return %arg0, %c0_i32 : i32, i32
  }
}

</mosaic_0001>

<bundles_post_ra>
// kernel: mlp_pallas.1
= control target key start
LH: loop header
LB: loop body
LE: loop exit
PB: predicated region body
PF: predicated region fallthrough
CT: control target
= control target key end

     0   :  { %s1080_s15 = smov 0   ;;  %s1307_s0 = inlined_call_operand.vmem [shape: s32[256,1], index: 0, kind: input, shape index: {}]   ;;  %s1308_s1 = inlined_call_operand.vmem [shape: f32[64,128], index: 1, kind: input, shape index: {}]   ;;  %s1309_s2 = inlined_call_operand.vmem [shape: f32[128,128], index: 2, kind: input, shape index: {}]   ;;  %s1310_s3 = inlined_call_operand.vmem [shape: f32[1,128], index: 3, kind: input, shape index: {}]   ;;  %s1311_s4 = inlined_call_operand.vmem [shape: f32[256,128], index: 4, kind: output, shape index: {}]  }
   0x1 LB: > { %s773_s16 = sadd.s32 4294967295, %s1051_s15   ;;  %p777_p0 = scmp.ge.s32.totalorder %s1051_s15, 1  ;;  %s1051_s15 = sphi %s1080_s15, %s14_s15  }
   0x2   : > { %p163_p1 = scmp.lt.s32.totalorder %s1051_s15, 3 }
   0x4   : > { %p164_p2 = pnand %p777_p0, %p163_p1 }
   0x5   : > { %s778_s17 = sshll.u32 (!%p164_p2), %s773_s16, 4  ;;  %v315_v0 = vld [vmem:[%s1308_s1] sm:$0xff] (!%p164_p2)  ;;  %v316_v1 = vld [vmem:[%s1308_s1 + $0x8] sm:$0xff] (!%p164_p2)  ;;  %v317_v2 = vld [vmem:[%s1308_s1 + $0x10] sm:$0xff] (!%p164_p2)  ;;  %v1053_v3 = vmov (!%p164_p2), 0   ;;  %v217_v53 = vlaneseq (!%p164_p2)  ;;  %vm323_vm0 = vcmask (!%p164_p2), 523264  }
   0x6   : > { %167 = sbr.rel (%p164_p2) target bundleno = 611 (0x263), region = 36  ;;  %1044 = vset.pattern.permute.xlu1 (!%p164_p2), %v1053_v3  ;;  %1043 = vset.pattern.permute.xlu0 (!%p164_p2), %v1053_v3  ;;  %p190_p3 = scmp.lt.s32.totalorder (!%p164_p2), %s778_s17, 31  ;;  %v969_v4 = vpack.c.bf16 (!%p164_p2), %v316_v1, %v315_v0  ;;  %v318_v5 = vld [vmem:[%s1308_s1 + $0x18] sm:$0xff] (!%p164_p2)  ;;  %v319_v7 = vld [vmem:[%s1308_s1 + $0x20] sm:$0xff] (!%p164_p2)  ;;  %v320_v8 = vld [vmem:[%s1308_s1 + $0x28] sm:$0xff] (!%p164_p2)  ;;  %v1054_v57 = vmov (!%p164_p2), 0.0  }
   0x7   : > { %v973_v6 = vpack.c.bf16 (!%p164_p2), %v318_v5, %v317_v2  ;;  %v977_v9 = vpack.c.bf16 (!%p164_p2), %v320_v8, %v319_v7  ;;  %v321_v14 = vld [vmem:[%s1308_s1 + $0x30] sm:$0xff] (!%p164_p2)  ;;  %v322_v15 = vld [vmem:[%s1308_s1 + $0x38] sm:$0xff] (!%p164_p2)  ;;  %v517_v29 = vld [vmem:[%s1309_s2] sm:$0xff] (!%p164_p2)  ;;  %v1214_v54 = vand.u32 (!%p164_p2), 127, %v217_v53 }
   0x8   : > { %970 = vmatprep.subr.bf16.mxu0 (!%p164_p2), %v969_v4  ;;  %v981_v18 = vpack.c.bf16 (!%p164_p2), %v322_v15, %v321_v14  ;;  %v518_v30 = vld [vmem:[%s1309_s2 + $0x8] sm:$0xff] (!%p164_p2)  ;;  %v519_v31 = vld [vmem:[%s1309_s2 + $0x10] sm:$0xff] (!%p164_p2)  ;;  %v520_v33 = vld [vmem:[%s1309_s2 + $0x18] sm:$0xff] (!%p164_p2) }
   0x9   : > { %972 = vmatpush3.bf16.msra.mxu0 (!%p164_p2), %v969_v4  ;;  %v985_v32 = vpack.c.bf16 (!%p164_p2), %v518_v30, %v517_v29  ;;  %v1150_v34 = vpack.c.bf16 (!%p164_p2), %v520_v33, %v519_v31  ;;  %v521_v35 = vld [vmem:[%s1309_s2 + $0x20] sm:$0xff] (!%p164_p2)  ;;  %v522_v36 = vld [vmem:[%s1309_s2 + $0x28] sm:$0xff] (!%p164_p2)  ;;  %v523_v38 = vld [vmem:[%s1309_s2 + $0x30] sm:$0xff] (!%p164_p2) }
   0xa   : > { %974 = vmatprep.subr.bf16.mxu0 (!%p164_p2), %v973_v6  ;;  %v1159_v37 = vpack.c.bf16 (!%p164_p2), %v522_v36, %v521_v35  ;;  %v524_v39 = vld [vmem:[%s1309_s2 + $0x38] sm:$0xff] (!%p164_p2)  ;;  %v525_v41 = vld [vmem:[%s1309_s2 + $0x40] sm:$0xff] (!%p164_p2)  ;;  %v526_v42 = vld [vmem:[%s1309_s2 + $0x48] sm:$0xff] (!%p164_p2) }
   0xb   : > { %1017 = vmatprep.subr.bf16.mxu1 (!%p164_p2), %v985_v32  ;;  %v1169_v40 = vpack.c.bf16 (!%p164_p2), %v524_v39, %v523_v38  ;;  %v1179_v43 = vpack.c.bf16 (!%p164_p2), %v526_v42, %v525_v41  ;;  %v527_v44 = vld [vmem:[%s1309_s2 + $0x50] sm:$0xff] (!%p164_p2)  ;;  %v528_v45 = vld [vmem:[%s1309_s2 + $0x58] sm:$0xff] (!%p164_p2)  ;;  %v529_v47 = vld [vmem:[%s1309_s2 + $0x60] sm:$0xff] (!%p164_p2) }
   0xc   : > { %1025 = vmatpush3.bf16.msra.mxu1 (!%p164_p2), %v985_v32  ;;  %v1189_v46 = vpack.c.bf16 (!%p164_p2), %v528_v45, %v527_v44  ;;  %v530_v48 = vld [vmem:[%s1309_s2 + $0x68] sm:$0xff] (!%p164_p2)  ;;  %v531_v50 = vld [vmem:[%s1309_s2 + $0x70] sm:$0xff] (!%p164_p2)  ;;  %v532_v51 = vld [vmem:[%s1309_s2 + $0x78] sm:$0xff] (!%p164_p2) }
   0xd   : > { %s1313_s17 = smov (!%p190_p3, %s778_s17), 31  ;;  %976 = vmatpush3.bf16.msra.mxu0 %v973_v6  ;;  %1018 = vmatprep.subr.bf16.mxu1 %v1150_v34  ;;  %v1199_v49 = vpack.c.bf16 %v530_v48, %v529_v47  ;;  %v1209_v52 = vpack.c.bf16 %v532_v51, %v531_v50 }
   0xe   : > { %s779_s30 = sshll.u32 %s1313_s17, 3  ;;  %978 = vmatprep.subr.bf16.mxu0 %v977_v9 }
   0xf   : > { %s1114_s7 = scalar_lea.vmem %s1307_s0, %s779_s30  ;;  %s1286_s27 = scalar_lea.vmem %s1311_s4, %s779_s30 }
  0x10   : > { %v203_v10 = vld [vmem:[%s1114_s7 + $0x10] sm:$0xff]  ;;  %v201_v11 = vld [vmem:[%s1114_s7] sm:$0xff]  ;;  %v204_v12 = vld [vmem:[%s1114_s7 + $0x18] sm:$0xff]  ;;  %1026 = vmatpush3.bf16.msra.mxu1 %v1150_v34 }
  0x11   : > { %226 = vperm.xlu1 %1044, %v203_v10   ;;  %220 = vperm.xlu0 %1043, %v201_v11   ;;  %v202_v13 = vld [vmem:[%s1114_s7 + $0x8] sm:$0xff]  ;;  %v205_v17 = vld [vmem:[%s1114_s7 + $0x20] sm:$0xff]  ;;  %v208_v19 = vld [vmem:[%s1114_s7 + $0x38] sm:$0xff] }
  0x12   : > { %v206_v16 = vld [vmem:[%s1114_s7 + $0x28] sm:$0xff]  ;;  %980 = vmatpush3.bf16.msra.mxu0 %v977_v9  ;;  %v207_v20 = vld [vmem:[%s1114_s7 + $0x30] sm:$0xff]  ;;  %v209_v22 = vld [vmem:[%s1114_s7 + $0x40] sm:$0xff]  ;;  %1019 = vmatprep.subr.bf16.mxu1 %v1159_v37 }
  0x13   : > { %982 = vmatprep.subr.bf16.mxu0 %v981_v18  ;;  %v210_v21 = vld [vmem:[%s1114_s7 + $0x48] sm:$0xff]  ;;  %v212_v23 = vld [vmem:[%s1114_s7 + $0x58] sm:$0xff]  ;;  %v211_v24 = vld [vmem:[%s1114_s7 + $0x50] sm:$0xff] }
  0x14   : > { %v214_v25 = vld [vmem:[%s1114_s7 + $0x68] sm:$0xff]  ;;  %v213_v26 = vld [vmem:[%s1114_s7 + $0x60] sm:$0xff]  ;;  %v216_v27 = vld [vmem:[%s1114_s7 + $0x78] sm:$0xff]  ;;  %1027 = vmatpush3.bf16.msra.mxu1 %v1159_v37 }
  0x15   : > { %229 = vperm.xlu1 %1044, %v204_v12   ;;  %223 = vperm.xlu0 %1043, %v202_v13   ;;  %v215_v28 = vld [vmem:[%s1114_s7 + $0x70] sm:$0xff] }
  0x16   : > { %984 = vmatpush3.bf16.msra.mxu0 %v981_v18  ;;  %1020 = vmatprep.subr.bf16.mxu1 %v1169_v40 }
  0x17   : > { %986 = vmatprep.subr.bf16.mxu0 %v985_v32 }
  0x18   : > { %1028 = vmatpush3.bf16.msra.mxu1 %v1169_v40 }
  0x19   : > { %235 = vperm.xlu1 %1044, %v206_v16   ;;  %232 = vperm.xlu0 %1043, %v205_v17  }
  0x1a   : > { %1021 = vmatprep.subr.bf16.mxu1 %v1179_v43 }
  0x1c   : > { %1029 = vmatpush3.bf16.msra.mxu1 %v1179_v43 }
  0x1d   : > { %241 = vperm.xlu1 %1044, %v208_v19   ;;  %238 = vperm.xlu0 %1043, %v207_v20  }
  0x1e   : > { %1022 = vmatprep.subr.bf16.mxu1 %v1189_v46 }
  0x20   : > { %1030 = vmatpush3.bf16.msra.mxu1 %v1189_v46 }
  0x21   : > { %247 = vperm.xlu1 %1044, %v210_v21   ;;  %244 = vperm.xlu0 %1043, %v209_v22  }
  0x22   : > { %1023 = vmatprep.subr.bf16.mxu1 %v1199_v49 }
  0x24   : > { %1031 = vmatpush3.bf16.msra.mxu1 %v1199_v49 }
  0x25   : > { %253 = vperm.xlu1 %1044, %v212_v23   ;;  %250 = vperm.xlu0 %1043, %v211_v24  }
  0x26   : > { %1024 = vmatprep.subr.bf16.mxu1 %v1209_v52 }
  0x28   : > { %1032 = vmatpush3.bf16.msra.mxu1 %v1209_v52 }
  0x29   : > { %259 = vperm.xlu1 %1044, %v214_v25   ;;  %256 = vperm.xlu0 %1043, %v213_v26  }
  0x2d   : > { %265 = vperm.xlu1 %1044, %v216_v27   ;;  %262 = vperm.xlu0 %1043, %v215_v28  }
  0x90   : > { %v227_v55 = vpop.permute.xlu1 %226  ;;  %v221_v56 = vpop.permute.xlu0 %220 }
  0x91   : > { %vm267_vm1 = vcmp.eq.s32.totalorder %v1214_v54, %v221_v56  ;;  %vm269_vm2 = vcmp.eq.s32.totalorder %v1214_v54, %v227_v55 }
  0x92   : > { %v782_v58 = vsel %vm267_vm1, 1.0, %v1054_v57  ;;  %v784_v61 = vsel %vm269_vm2, 1.0, %v1054_v57 }
  0x93   : > { %889 = vmatprep.mubr.msk.f32.mxu0 %vm323_vm0, %v782_v58 }
  0x94   : > { %v230_v59 = vpop.permute.xlu1 %229  ;;  %v224_v60 = vpop.permute.xlu0 %223 }
  0x95   : > { %vm268_vm3 = vcmp.eq.s32.totalorder %v1214_v54, %v224_v60  ;;  %vm270_vm4 = vcmp.eq.s32.totalorder %v1214_v54, %v230_v59 }
  0x96   : > { %v783_v62 = vsel %vm268_vm3, 1.0, %v1054_v57  ;;  %v785_v1 = vsel %vm270_vm4, 1.0, %v1054_v57 }
  0x97   : > { %890 = vmatmul.mubr.msk.f32.vlgmr.msra.gmra.mrb[0].mxu0 %vm323_vm0, %v783_v62 }
  0x98   : > { %v236_v63 = vpop.permute.xlu1 %235  ;;  %892 = vmatprep.mubr.msk.f32.mxu0 %vm323_vm0, %v784_v61  ;;  %v233_v0 = vpop.permute.xlu0 %232  ;;  %988 = vmatpush3.bf16.msra.mxu0 %v985_v32 }
  0x99   : > { %vm271_vm5 = vcmp.eq.s32.totalorder %v1214_v54, %v233_v0  ;;  %990 = vmatprep.subr.bf16.mxu0 %v1150_v34  ;;  %vm272_vm6 = vcmp.eq.s32.totalorder %v1214_v54, %v236_v63 }
  0x9a   : > { %v786_v2 = vsel %vm271_vm5, 1.0, %v1054_v57  ;;  %v787_v5 = vsel %vm272_vm6, 1.0, %v1054_v57 }
  0x9b   : > { %893 = vmatmul.mubr.msk.f32.gmra.mrb[2].mxu0 %vm323_vm0, %v785_v1 }
  0x9c   : > { %v242_v3 = vpop.permute.xlu1 %241  ;;  %895 = vmatprep.mubr.msk.f32.mxu0 %vm323_vm0, %v786_v2  ;;  %v239_v4 = vpop.permute.xlu0 %238  ;;  %992 = vmatpush3.bf16.msra.mxu0 %v1150_v34 }
  0x9d   : > { %vm273_vm7 = vcmp.eq.s32.totalorder %v1214_v54, %v239_v4  ;;  %994 = vmatprep.subr.bf16.mxu0 %v1159_v37  ;;  %vm274_vm8 = vcmp.eq.s32.totalorder %v1214_v54, %v242_v3 }
  0x9e   : > { %v788_v6 = vsel %vm273_vm7, 1.0, %v1054_v57  ;;  %v789_v9 = vsel %vm274_vm8, 1.0, %v1054_v57 }
  0x9f   : > { %896 = vmatmul.mubr.msk.f32.gmra.mrb[4].mxu0 %vm323_vm0, %v787_v5 }
  0xa0   : > { %v248_v7 = vpop.permute.xlu1 %247  ;;  %898 = vmatprep.mubr.msk.f32.mxu0 %vm323_vm0, %v788_v6  ;;  %v245_v8 = vpop.permute.xlu0 %244  ;;  %996 = vmatpush3.bf16.msra.mxu0 %v1159_v37 }
  0xa1   : > { %vm275_vm9 = vcmp.eq.s32.totalorder %v1214_v54, %v245_v8  ;;  %998 = vmatprep.subr.bf16.mxu0 %v1169_v40  ;;  %vm276_vm10 = vcmp.eq.s32.totalorder %v1214_v54, %v248_v7 }
  0xa2   : > { %v790_v10 = vsel %vm275_vm9, 1.0, %v1054_v57  ;;  %v791_v13 = vsel %vm276_vm10, 1.0, %v1054_v57 }
  0xa3   : > { %899 = vmatmul.mubr.msk.f32.gmra.mrb[6].mxu0 %vm323_vm0, %v789_v9 }
  0xa4   : > { %v254_v11 = vpop.permute.xlu1 %253  ;;  %901 = vmatprep.mubr.msk.f32.mxu0 %vm323_vm0, %v790_v10  ;;  %v251_v12 = vpop.permute.xlu0 %250  ;;  %1000 = vmatpush3.bf16.msra.mxu0 %v1169_v40  ;;  %v814_v40 = vld [vmem:[%s1310_s3] ss:$0 sm:$0xff] }
  0xa5   : > { %vm277_vm11 = vcmp.eq.s32.totalorder %v1214_v54, %v251_v12  ;;  %1002 = vmatprep.subr.bf16.mxu0 %v1179_v43  ;;  %vm278_vm12 = vcmp.eq.s32.totalorder %v1214_v54, %v254_v11 }
  0xa6   : > { %v792_v14 = vsel %vm277_vm11, 1.0, %v1054_v57  ;;  %v793_v17 = vsel %vm278_vm12, 1.0, %v1054_v57 }
  0xa7   : > { %902 = vmatmul.mubr.msk.f32.gmra.mrb[8].mxu0 %vm323_vm0, %v791_v13 }
  0xa8   : > { %v260_v15 = vpop.permute.xlu1 %259  ;;  %904 = vmatprep.mubr.msk.f32.mxu0 %vm323_vm0, %v792_v14  ;;  %v257_v16 = vpop.permute.xlu0 %256  ;;  %1004 = vmatpush3.bf16.msra.mxu0 %v1179_v43 }
  0xa9   : > { %vm279_vm13 = vcmp.eq.s32.totalorder %v1214_v54, %v257_v16  ;;  %1006 = vmatprep.subr.bf16.mxu0 %v1189_v46  ;;  %vm280_vm14 = vcmp.eq.s32.totalorder %v1214_v54, %v260_v15 }
  0xaa   : > { %v794_v18 = vsel %vm279_vm13, 1.0, %v1054_v57  ;;  %v795_v21 = vsel %vm280_vm14, 1.0, %v1054_v57 }
  0xab   : > { %905 = vmatmul.mubr.msk.f32.gmra.mrb[10].mxu0 %vm323_vm0, %v793_v17 }
  0xac   : > { %v266_v19 = vpop.permute.xlu1 %265  ;;  %907 = vmatprep.mubr.msk.f32.mxu0 %vm323_vm0, %v794_v18  ;;  %v263_v20 = vpop.permute.xlu0 %262  ;;  %1008 = vmatpush3.bf16.msra.mxu0 %v1189_v46 }
  0xad   : > { %vm281_vm15 = vcmp.eq.s32.totalorder %v1214_v54, %v263_v20  ;;  %1010 = vmatprep.subr.bf16.mxu0 %v1199_v49  ;;  %vm282_vm1 = vcmp.eq.s32.totalorder %v1214_v54, %v266_v19 }
  0xae   : > { %v796_v22 = vsel %vm281_vm15, 1.0, %v1054_v57  ;;  %v797_v23 = vsel %vm282_vm1, 1.0, %v1054_v57 }
  0xaf   : > { %908 = vmatmul.mubr.msk.f32.gmra.mrb[12].mxu0 %vm323_vm0, %v795_v21 }
  0xb0   : > { %910 = vmatprep.mubr.msk.f32.mxu0 %vm323_vm0, %v796_v22  ;;  %1012 = vmatpush3.bf16.msra.mxu0 %v1199_v49 }
  0xb1   : > { %1014 = vmatprep.subr.bf16.mxu0 %v1209_v52 }
  0xb3   : > { %911 = vmatmul.mubr.msk.f32.gmra.mrb[14].mxu0 %vm323_vm0, %v797_v23 }
  0xb4   : > { %1016 = vmatpush3.bf16.msra.mxu0 %v1209_v52 }
 0x16a   : > { %v891_v24 = vpop.f32.mrb[0].mxu0 }
 0x16b   : > { %v438_v25 = vpop.f32.mrb[1].mxu0 }
 0x16c   : > { %945 = vmatprep.mubr.f32.mxu0 %v438_v25 }
 0x16d   : > { %946 = vmatmul.mubr.f32.vlgmr.msra.gmra.mrb[16].mxu0 %v891_v24 }
 0x16e   : > { %v894_v26 = vpop.f32.mrb[2].mxu0 }
 0x16f   : > { %v448_v27 = vpop.f32.mrb[3].mxu0 }
 0x170   : > { %948 = vmatprep.mubr.f32.mxu0 %v448_v27 }
 0x171   : > { %949 = vmatmul.mubr.f32.gmra.mrb[18].mxu0 %v894_v26 }
 0x172   : > { %v897_v28 = vpop.f32.mrb[4].mxu0 }
 0x173   : > { %v458_v29 = vpop.f32.mrb[5].mxu0 }
 0x174   : > { %951 = vmatprep.mubr.f32.mxu1 %v458_v29 }
 0x175   : > { %952 = vmatmul.mubr.f32.vlgmr.msra.gmra.mrb[0].mxu1 %v897_v28 }
 0x176   : > { %v900_v30 = vpop.f32.mrb[6].mxu0 }
 0x177   : > { %v468_v31 = vpop.f32.mrb[7].mxu0 }
 0x178   : > { %954 = vmatprep.mubr.f32.mxu1 %v468_v31 }
 0x179   : > { %955 = vmatmul.mubr.f32.gmra.mrb[2].mxu1 %v900_v30 }
 0x17a   : > { %v903_v32 = vpop.f32.mrb[8].mxu0 }
 0x17b   : > { %v478_v33 = vpop.f32.mrb[9].mxu0 }
 0x17c   : > { %957 = vmatprep.mubr.f32.mxu1 %v478_v33 }
 0x17d   : > { %958 = vmatmul.mubr.f32.gmra.mrb[4].mxu1 %v903_v32 }
 0x17e   : > { %v906_v34 = vpop.f32.mrb[10].mxu0 }
 0x17f   : > { %v488_v35 = vpop.f32.mrb[11].mxu0 }
 0x180   : > { %960 = vmatprep.mubr.f32.mxu1 %v488_v35 }
 0x181   : > { %961 = vmatmul.mubr.f32.gmra.mrb[6].mxu1 %v906_v34 }
 0x182   : > { %v909_v36 = vpop.f32.mrb[12].mxu0 }
 0x183   : > { %v498_v37 = vpop.f32.mrb[13].mxu0 }
 0x184   : > { %963 = vmatprep.mubr.f32.mxu1 %v498_v37 }
 0x185   : > { %964 = vmatmul.mubr.f32.gmra.mrb[8].mxu1 %v909_v36 }
 0x186   : > { %v912_v38 = vpop.f32.mrb[14].mxu0 }
 0x187   : > { %v508_v39 = vpop.f32.mrb[15].mxu0 }
 0x188   : > { %966 = vmatprep.mubr.f32.mxu1 %v508_v39 }
 0x189   : > { %967 = vmatmul.mubr.f32.gmra.mrb[10].mxu1 %v912_v38 }
 0x240   : > { %v947_v41 = vpop.f32.mrb[16].mxu0 }
 0x241   : > { %v612_v42 = vadd.f32 %v947_v41, %v814_v40  ;;  %v606_v43 = vpop.f32.mrb[17].mxu0 }
 0x242   : > { %v607_v44 = vadd.f32 %v814_v40, %v606_v43 }
 0x243   : > { %v686_v45 = vmax.f32 %v612_v42, 0.0 }
 0x244   : > { %v685_v46 = vmax.f32 %v607_v44, 0.0  ;;  %v950_v47 = vpop.f32.mrb[18].mxu0 }
 0x245   : > { %702 = vst [vmem:[%s1286_s27 + $0x8] sm:$0xff] %v686_v45  ;;  %v622_v48 = vadd.f32 %v950_v47, %v814_v40  ;;  %v616_v49 = vpop.f32.mrb[19].mxu0 }
 0x246   : > { %701 = vst [vmem:[%s1286_s27] sm:$0xff] %v685_v46  ;;  %v617_v50 = vadd.f32 %v814_v40, %v616_v49 }
 0x247   : > { %v688_v51 = vmax.f32 %v622_v48, 0.0 }
 0x248   : > { %v687_v52 = vmax.f32 %v617_v50, 0.0  ;;  %v953_v53 = vpop.f32.mrb[0].mxu1 }
 0x249   : > { %704 = vst [vmem:[%s1286_s27 + $0x18] sm:$0xff] %v688_v51  ;;  %v632_v54 = vadd.f32 %v953_v53, %v814_v40  ;;  %v626_v55 = vpop.f32.mrb[1].mxu1 }
 0x24a   : > { %703 = vst [vmem:[%s1286_s27 + $0x10] sm:$0xff] %v687_v52  ;;  %v627_v56 = vadd.f32 %v814_v40, %v626_v55 }
 0x24b   : > { %v690_v57 = vmax.f32 %v632_v54, 0.0 }
 0x24c   : > { %v689_v58 = vmax.f32 %v627_v56, 0.0  ;;  %v956_v59 = vpop.f32.mrb[2].mxu1 }
 0x24d   : > { %706 = vst [vmem:[%s1286_s27 + $0x28] sm:$0xff] %v690_v57  ;;  %v642_v60 = vadd.f32 %v956_v59, %v814_v40  ;;  %v636_v61 = vpop.f32.mrb[3].mxu1 }
 0x24e   : > { %705 = vst [vmem:[%s1286_s27 + $0x20] sm:$0xff] %v689_v58  ;;  %v637_v62 = vadd.f32 %v814_v40, %v636_v61 }
 0x24f   : > { %v692_v63 = vmax.f32 %v642_v60, 0.0 }
 0x250   : > { %v691_v0 = vmax.f32 %v637_v62, 0.0  ;;  %v959_v1 = vpop.f32.mrb[4].mxu1 }
 0x251   : > { %708 = vst [vmem:[%s1286_s27 + $0x38] sm:$0xff] %v692_v63  ;;  %v652_v2 = vadd.f32 %v959_v1, %v814_v40  ;;  %v646_v3 = vpop.f32.mrb[5].mxu1 }
 0x252   : > { %707 = vst [vmem:[%s1286_s27 + $0x30] sm:$0xff] %v691_v0  ;;  %v647_v4 = vadd.f32 %v814_v40, %v646_v3 }
 0x253   : > { %v694_v5 = vmax.f32 %v652_v2, 0.0 }
 0x254   : > { %v693_v6 = vmax.f32 %v647_v4, 0.0  ;;  %v962_v7 = vpop.f32.mrb[6].mxu1 }
 0x255   : > { %710 = vst [vmem:[%s1286_s27 + $0x48] sm:$0xff] %v694_v5  ;;  %v662_v8 = vadd.f32 %v962_v7, %v814_v40  ;;  %v656_v9 = vpop.f32.mrb[7].mxu1 }
 0x256   : > { %709 = vst [vmem:[%s1286_s27 + $0x40] sm:$0xff] %v693_v6  ;;  %v657_v10 = vadd.f32 %v814_v40, %v656_v9 }
 0x257   : > { %v696_v11 = vmax.f32 %v662_v8, 0.0 }
 0x258   : > { %v695_v12 = vmax.f32 %v657_v10, 0.0  ;;  %v965_v13 = vpop.f32.mrb[8].mxu1 }
 0x259   : > { %712 = vst [vmem:[%s1286_s27 + $0x58] sm:$0xff] %v696_v11  ;;  %v672_v14 = vadd.f32 %v965_v13, %v814_v40  ;;  %v666_v15 = vpop.f32.mrb[9].mxu1 }
 0x25a   : > { %711 = vst [vmem:[%s1286_s27 + $0x50] sm:$0xff] %v695_v12  ;;  %v667_v16 = vadd.f32 %v814_v40, %v666_v15 }
 0x25b   : > { %v698_v17 = vmax.f32 %v672_v14, 0.0 }
 0x25c   : > { %v697_v18 = vmax.f32 %v667_v16, 0.0  ;;  %v968_v19 = vpop.f32.mrb[10].mxu1 }
 0x25d   : > { %714 = vst [vmem:[%s1286_s27 + $0x68] sm:$0xff] %v698_v17  ;;  %v682_v20 = vadd.f32 %v968_v19, %v814_v40  ;;  %v676_v21 = vpop.f32.mrb[11].mxu1 }
 0x25e   : > { %713 = vst [vmem:[%s1286_s27 + $0x60] sm:$0xff] %v697_v18  ;;  %v677_v22 = vadd.f32 %v814_v40, %v676_v21 }
 0x25f   : > { %v700_v23 = vmax.f32 %v682_v20, 0.0 }
 0x260   : > { %v699_v24 = vmax.f32 %v677_v22, 0.0 }
 0x261   : > { %716 = vst [vmem:[%s1286_s27 + $0x78] sm:$0xff] %v700_v23 }
 0x262   : > { %715 = vst [vmem:[%s1286_s27 + $0x70] sm:$0xff] %v699_v24 }
 0x263 PF: > { %s14_s15 = sadd.s32 1, %s1051_s15  }
 0x264   : > { %p11_p4 = scmp.ge.s32.totalorder %s14_s15, 4  }
 0x266   :  { %13 = sbr.rel (!%p11_p4) target bundleno = 1 (0x1), region = 66 }

</bundles_post_ra>
